<compile_context>
chip_gen: v5e
topology: v5e:2x2
jax: 0.10.0
libtpu: 0.0.40
codegen_flags: <defaults>
</compile_context>

<pallas_src>
import functools

import jax
import jax.numpy as jnp
from jax.experimental import pallas as pl
from jax.experimental.pallas import tpu as pltpu


# ---------------------------------------------------------------------------
# fused single-pass kernel: stats + normalize on a resident channel-tile slab
# ---------------------------------------------------------------------------

def _bn_fused_kernel(x_ref, w_ref, b_ref, o_ref, mean_ref, var_ref,
                     *, inv_count, eps):
    """x_ref: (N, c_t, HW); w/b/mean/var refs: (c_t, 1) f32; o_ref like x."""
    x = x_ref[...].astype(jnp.float32)                 # slab-local upcast
    s = jnp.sum(x, axis=2, keepdims=True)              # (N, c_t, 1) lane reduce
    mean = jnp.sum(s, axis=0) * inv_count              # (c_t, 1)
    xc = x - mean[None]                                # centered, reused below
    q = jnp.sum(xc * xc, axis=2, keepdims=True)        # (N, c_t, 1)
    var = jnp.sum(q, axis=0) * inv_count               # (c_t, 1) biased var
    inv_std = jax.lax.rsqrt(var + eps)                 # EUP
    scale = w_ref[...] * inv_std                       # (c_t, 1)
    o_ref[...] = (xc * scale[None] + b_ref[...][None]).astype(o_ref.dtype)
    mean_ref[...] = mean
    var_ref[...] = var


# ---------------------------------------------------------------------------
# two-pass fallback kernels (tiled reduction + elementwise normalize)
# ---------------------------------------------------------------------------

def _bn_stats_kernel(x_ref, sum_ref, sumsq_ref):
    """Accumulate per-channel sum / sum-of-squares into resident (c_t,1) blocks."""
    ni = pl.program_id(1)
    li = pl.program_id(2)

    @pl.when(jnp.logical_and(ni == 0, li == 0))
    def _():
        sum_ref[...] = jnp.zeros_like(sum_ref)
        sumsq_ref[...] = jnp.zeros_like(sumsq_ref)

    x = x_ref[...].astype(jnp.float32)              # (n_t, c_t, l_t)
    ps = jnp.sum(x, axis=2, keepdims=True)          # lane reduce
    pq = jnp.sum(x * x, axis=2, keepdims=True)
    sum_ref[...] += jnp.sum(ps, axis=0)             # (c_t, 1)
    sumsq_ref[...] += jnp.sum(pq, axis=0)


def _bn_norm_kernel(x_ref, scale_ref, shift_ref, o_ref):
    """o = x * scale + shift with per-channel fused affine."""
    x = x_ref[...].astype(jnp.float32)
    o_ref[...] = (x * scale_ref[...] + shift_ref[...]).astype(o_ref.dtype)


# ---------------------------------------------------------------------------
# tile / budget selection
# ---------------------------------------------------------------------------

_FALLBACK_BLOCK_BUDGET = 4 * 1024 * 1024  # per block buffer for the 2-pass path


def _vmem_budget_bytes():
    """~70% of per-core VMEM; conservative 64 MiB (v7x) fallback."""
    cap = None
    try:
        cap = getattr(pltpu.get_tpu_info(), "vmem_capacity_bytes", None)
    except Exception:
        cap = None
    if not cap:
        cap = 64 * 1024 * 1024
    return max(32 * 1024 * 1024, int(cap * 0.7))


def _sublane_pack(itemsize):
    return {4: 8, 2: 16, 1: 32}.get(itemsize, 8)


def _fused_channel_tile(N, C, HW, itemsize, budget):
    """Largest channel tile whose fused slab fits the VMEM budget, or None."""
    def fits(ct):
        # 2x double-buffered input + 2x output + ~3 f32 intermediate slabs
        need = N * ct * HW * (4 * itemsize + 3 * 4)
        return need <= budget

    cands = [d for d in range(8, C + 1, 8) if C % d == 0]
    if not cands:
        cands = [C]                       # full-C block (exempt from 8-rule)
    fitting = [ct for ct in cands if fits(ct)]
    if not fitting:
        return None
    pack = _sublane_pack(itemsize)
    packed = [ct for ct in fitting if ct % pack == 0]
    return max(packed) if packed else max(fitting)


def _largest_divisor_multiple(n, base, cap):
    best = None
    t = base
    while t <= min(n, cap):
        if n % t == 0:
            best = t
        t += base
    return best


def _largest_divisor_leq(n, cap):
    best = 1
    for d in range(1, n + 1):
        if d <= cap and n % d == 0:
            best = d
    return best


def _choose_two_pass_tiles(N, C, HW, itemsize):
    pack = _sublane_pack(itemsize)
    if C % pack == 0:
        c_t = pack
    elif C % 8 == 0:
        c_t = 8
    else:
        c_t = C
    lane_cap = max(128, _FALLBACK_BLOCK_BUDGET // (c_t * itemsize))
    hw_pad = HW
    l_t = _largest_divisor_multiple(HW, 128, lane_cap)
    if l_t is None:
        if HW <= lane_cap:
            l_t = HW                      # full-dim block (exempt from 128 rule)
        else:
            # pad spatial axis once so a bounded lane-dense tile always exists
            hw_pad = ((HW + 127) // 128) * 128
            l_t = _largest_divisor_multiple(hw_pad, 128, lane_cap) or 128
    n_cap = max(1, _FALLBACK_BLOCK_BUDGET // (c_t * l_t * itemsize))
    n_t = _largest_divisor_leq(N, n_cap)
    return n_t, c_t, l_t, hw_pad


# ---------------------------------------------------------------------------
# wrapper
# ---------------------------------------------------------------------------

def bn_forward(x_nchw, weight, bias, eps=1e-5,
               running_mean=None, running_var=None, momentum=0.1,
               force_two_pass=False):
    """Training-mode BatchNorm2d forward (batch statistics), NCHW in/out.

    If running_mean/running_var are given, also returns the functionally
    updated buffers.  NOTE: the reference module updates running_var with the
    *biased* batch variance (it reuses its unbiased=False var), so we match
    that exactly.
    """
    N, C, H, W = x_nchw.shape
    HW = H * W
    count = N * HW
    x3 = x_nchw.reshape(N, C, HW)          # metadata-only (contiguous NCHW)
    itemsize = jnp.dtype(x_nchw.dtype).itemsize
    w2 = weight.reshape(C, 1).astype(jnp.float32)
    b2 = bias.reshape(C, 1).astype(jnp.float32)
    vmem_budget = _vmem_budget_bytes()

    c_t = None if force_two_pass else _fused_channel_tile(
        N, C, HW, itemsize, vmem_budget)

    if c_t is not None:
        # ---- fused single pass: 1 HBM read + 1 HBM write of x -------------
        kern = functools.partial(_bn_fused_kernel,
                                 inv_count=float(1.0 / count), eps=float(eps))
        slab_spec = pl.BlockSpec((N, c_t, HW), lambda ci: (0, ci, 0))
        ch_spec = pl.BlockSpec((c_t, 1), lambda ci: (ci, 0))
        # TODO(synk): on v7x with C // c_t == 1 only one TensorCore is used;
        # a cross-core N split would need partial-stat exchange.
        out3, mean, var = pl.pallas_call(
            kern,
            out_shape=(jax.ShapeDtypeStruct((N, C, HW), x_nchw.dtype),
                       jax.ShapeDtypeStruct((C, 1), jnp.float32),
                       jax.ShapeDtypeStruct((C, 1), jnp.float32)),
            grid_spec=pltpu.PrefetchScalarGridSpec(
                num_scalar_prefetch=0,
                grid=(C // c_t,),
                in_specs=[slab_spec, ch_spec, ch_spec],
                out_specs=[slab_spec, ch_spec, ch_spec]),
            compiler_params=pltpu.CompilerParams(
                dimension_semantics=("parallel",),
                vmem_limit_bytes=vmem_budget),
        )(x3, w2, b2)
        out = out3.reshape(N, C, H, W)
    else:
        # ---- fallback: tiled two-pass (stats, then normalize) -------------
        n_t, c_t2, l_t, hw_pad = _choose_two_pass_tiles(N, C, HW, itemsize)
        x3p = x3 if hw_pad == HW else jnp.pad(
            x3, ((0, 0), (0, 0), (0, hw_pad - HW)))   # zeros: sum/sumsq-neutral
        grid = (C // c_t2, N // n_t, hw_pad // l_t)
        x_spec = pl.BlockSpec((n_t, c_t2, l_t), lambda ci, ni, li: (ni, ci, li))
        ch_spec = pl.BlockSpec((c_t2, 1), lambda ci, ni, li: (ci, 0))

        sums, sumsqs = pl.pallas_call(
            _bn_stats_kernel,
            out_shape=(jax.ShapeDtypeStruct((C, 1), jnp.float32),
                       jax.ShapeDtypeStruct((C, 1), jnp.float32)),
            grid_spec=pltpu.PrefetchScalarGridSpec(
                num_scalar_prefetch=0, grid=grid,
                in_specs=[x_spec],
                out_specs=[ch_spec, ch_spec]),
            compiler_params=pltpu.CompilerParams(
                dimension_semantics=("parallel", "arbitrary", "arbitrary"),
                vmem_limit_bytes=vmem_budget),
        )(x3p)

        inv_count = jnp.float32(1.0 / count)
        mean = sums * inv_count
        # TODO(synk): E[x^2]-mean^2 can lose precision for channels with large
        # mean/std ratio; the fused path uses centered moments instead.
        var = jnp.maximum(sumsqs * inv_count - mean * mean, 0.0)
        inv_std = jax.lax.rsqrt(var + jnp.float32(eps))
        scale = w2 * inv_std
        shift = b2 - mean * scale

        out3 = pl.pallas_call(
            _bn_norm_kernel,
            out_shape=jax.ShapeDtypeStruct((N, C, hw_pad), x_nchw.dtype),
            grid_spec=pltpu.PrefetchScalarGridSpec(
                num_scalar_prefetch=0, grid=grid,
                in_specs=[x_spec, ch_spec, ch_spec],
                out_specs=x_spec),
            compiler_params=pltpu.CompilerParams(
                dimension_semantics=("parallel", "parallel", "parallel"),
                vmem_limit_bytes=vmem_budget),
        )(x3p, scale, shift)
        out = out3[:, :, :HW].reshape(N, C, H, W)

    if running_mean is not None and running_var is not None:
        new_rm = (1.0 - momentum) * running_mean + momentum * mean.reshape(C)
        new_rv = (1.0 - momentum) * running_var + momentum * var.reshape(C)
        return out, new_rm, new_rv
    return out


def _bn_reference(x_nchw, weight, bias, eps=1e-5):
    mean = jnp.mean(x_nchw, axis=(0, 2, 3), keepdims=True)
    var = jnp.var(x_nchw, axis=(0, 2, 3), keepdims=True)
    xh = (x_nchw - mean) / jnp.sqrt(var + eps)
    return xh * weight.reshape(1, -1, 1, 1) + bias.reshape(1, -1, 1, 1)


if __name__ == "__main__":
    key = jax.random.PRNGKey(0)
    kx, kw = jax.random.split(key)

    N, C, H, W = 2, 4, 16, 16
    x = jax.random.normal(kx, (N, C, H, W), dtype=jnp.float32)
    # reset_parameters(): weight ~ uniform[0,1), bias = 0
    weight = jax.random.uniform(kw, (C,), dtype=jnp.float32)
    bias = jnp.zeros((C,), dtype=jnp.float32)

    ref = _bn_reference(x, weight, bias, eps=1e-5)

    # fused single-pass path (the common case)
    out_fused = jax.block_until_ready(bn_forward(x, weight, bias, eps=1e-5))
    assert out_fused.shape == (N, C, H, W)
    assert jnp.allclose(out_fused, ref, atol=1e-4, rtol=1e-5), "fused mismatch"

    # tiled two-pass fallback path
    out_2p = jax.block_until_ready(
        bn_forward(x, weight, bias, eps=1e-5, force_two_pass=True))
    assert jnp.allclose(out_2p, ref, atol=1e-4, rtol=1e-5), "two-pass mismatch"

    print("KERNEL_OK")
</pallas_src>

<mosaic_0001>
module attributes {stable_mosaic.version = 11 : i64} {
  func.func @_bn_fused_kernel(%arg0: i32, %arg1: memref<2x4x256xf32, #tpu.memory_space<vmem>>, %arg2: memref<4x1xf32, #tpu.memory_space<vmem>>, %arg3: memref<4x1xf32, #tpu.memory_space<vmem>>, %arg4: memref<2x4x256xf32, #tpu.memory_space<vmem>>, %arg5: memref<4x1xf32, #tpu.memory_space<vmem>>, %arg6: memref<4x1xf32, #tpu.memory_space<vmem>>) attributes {dimension_semantics = [#tpu.dimension_semantics<parallel>], iteration_bounds = array<i64: 1>, scalar_prefetch = 0 : i64, scratch_operands = 0 : i64, tpu.core_type = #tpu.core_type<tc>, window_params = [{transform_indices = @transform_0, window_bounds = array<i64: 2, 4, 256>}, {transform_indices = @transform_1, window_bounds = array<i64: 4, 1>}, {transform_indices = @transform_2, window_bounds = array<i64: 4, 1>}, {transform_indices = @transform_3, window_bounds = array<i64: 2, 4, 256>}, {transform_indices = @transform_4, window_bounds = array<i64: 4, 1>}, {transform_indices = @transform_5, window_bounds = array<i64: 4, 1>}]} {
    %c0 = arith.constant 0 : index
    %c0_0 = arith.constant 0 : index
    %c0_1 = arith.constant 0 : index
    %0 = vector.load %arg1[%c0, %c0_0, %c0_1] : memref<2x4x256xf32, #tpu.memory_space<vmem>>, vector<2x4x256xf32>
    %cst = arith.constant dense<0.000000e+00> : vector<2x4xf32>
    %1 = vector.multi_reduction <add>, %0, %cst [2] : vector<2x4x256xf32> to vector<2x4xf32>
    %2 = vector.shape_cast %1 : vector<2x4xf32> to vector<2x4x1xf32>
    %cst_2 = arith.constant dense<0.000000e+00> : vector<4x1xf32>
    %3 = vector.multi_reduction <add>, %2, %cst_2 [0] : vector<2x4x1xf32> to vector<4x1xf32>
    %cst_3 = arith.constant 0.001953125 : f32
    %4 = vector.broadcast %cst_3 : f32 to vector<4x1xf32>
    %5 = arith.mulf %3, %4 : vector<4x1xf32>
    %6 = vector.shape_cast %5 : vector<4x1xf32> to vector<1x4x1xf32>
    %7 = vector.broadcast %6 : vector<1x4x1xf32> to vector<2x4x256xf32>
    %8 = arith.subf %0, %7 : vector<2x4x256xf32>
    %9 = arith.mulf %8, %8 : vector<2x4x256xf32>
    %cst_4 = arith.constant dense<0.000000e+00> : vector<2x4xf32>
    %10 = vector.multi_reduction <add>, %9, %cst_4 [2] : vector<2x4x256xf32> to vector<2x4xf32>
    %11 = vector.shape_cast %10 : vector<2x4xf32> to vector<2x4x1xf32>
    %cst_5 = arith.constant dense<0.000000e+00> : vector<4x1xf32>
    %12 = vector.multi_reduction <add>, %11, %cst_5 [0] : vector<2x4x1xf32> to vector<4x1xf32>
    %cst_6 = arith.constant 0.001953125 : f32
    %13 = vector.broadcast %cst_6 : f32 to vector<4x1xf32>
    %14 = arith.mulf %12, %13 : vector<4x1xf32>
    %cst_7 = arith.constant 9.99999974E-6 : f32
    %15 = vector.broadcast %cst_7 : f32 to vector<4x1xf32>
    %16 = arith.addf %14, %15 : vector<4x1xf32>
    %17 = math.rsqrt %16 : vector<4x1xf32>
    %c0_8 = arith.constant 0 : index
    %c0_9 = arith.constant 0 : index
    %18 = vector.load %arg2[%c0_8, %c0_9] : memref<4x1xf32, #tpu.memory_space<vmem>>, vector<4x1xf32>
    %19 = arith.mulf %18, %17 : vector<4x1xf32>
    %20 = vector.shape_cast %19 : vector<4x1xf32> to vector<1x4x1xf32>
    %21 = vector.broadcast %20 : vector<1x4x1xf32> to vector<2x4x256xf32>
    %22 = arith.mulf %8, %21 : vector<2x4x256xf32>
    %c0_10 = arith.constant 0 : index
    %c0_11 = arith.constant 0 : index
    %23 = vector.load %arg3[%c0_10, %c0_11] : memref<4x1xf32, #tpu.memory_space<vmem>>, vector<4x1xf32>
    %24 = vector.shape_cast %23 : vector<4x1xf32> to vector<1x4x1xf32>
    %25 = vector.broadcast %24 : vector<1x4x1xf32> to vector<2x4x256xf32>
    %26 = arith.addf %22, %25 : vector<2x4x256xf32>
    %c0_12 = arith.constant 0 : index
    %c0_13 = arith.constant 0 : index
    %c0_14 = arith.constant 0 : index
    %27 = vector.load %arg4[%c0_12, %c0_13, %c0_14] : memref<2x4x256xf32, #tpu.memory_space<vmem>>, vector<2x4x256xf32>
    tpu.vector_store %arg4[%c0_12, %c0_13, %c0_14], %26 {strides = array<i32>} : memref<2x4x256xf32, #tpu.memory_space<vmem>>, vector<2x4x256xf32>,
    %c0_15 = arith.constant 0 : index
    %c0_16 = arith.constant 0 : index
    %28 = vector.load %arg5[%c0_15, %c0_16] : memref<4x1xf32, #tpu.memory_space<vmem>>, vector<4x1xf32>
    tpu.vector_store %arg5[%c0_15, %c0_16], %5 {strides = array<i32>} : memref<4x1xf32, #tpu.memory_space<vmem>>, vector<4x1xf32>,
    %c0_17 = arith.constant 0 : index
    %c0_18 = arith.constant 0 : index
    %29 = vector.load %arg6[%c0_17, %c0_18] : memref<4x1xf32, #tpu.memory_space<vmem>>, vector<4x1xf32>
    tpu.vector_store %arg6[%c0_17, %c0_18], %14 {strides = array<i32>} : memref<4x1xf32, #tpu.memory_space<vmem>>, vector<4x1xf32>,
    return
  }
  func.func @transform_0(%arg0: i32) -> (i32, i32, i32) {
    %c0_i32 = arith.constant 0 : i32
    %c0_i32_0 = arith.constant 0 : i32
    %c0_i32_1 = arith.constant 0 : i32
    return %c0_i32, %arg0, %c0_i32_0 : i32, i32, i32
  }
  func.func @transform_1(%arg0: i32) -> (i32, i32) {
    %c0_i32 = arith.constant 0 : i32
    %c0_i32_0 = arith.constant 0 : i32
    return %arg0, %c0_i32 : i32, i32
  }
  func.func @transform_2(%arg0: i32) -> (i32, i32) {
    %c0_i32 = arith.constant 0 : i32
    %c0_i32_0 = arith.constant 0 : i32
    return %arg0, %c0_i32 : i32, i32
  }
  func.func @transform_3(%arg0: i32) -> (i32, i32, i32) {
    %c0_i32 = arith.constant 0 : i32
    %c0_i32_0 = arith.constant 0 : i32
    %c0_i32_1 = arith.constant 0 : i32
    return %c0_i32, %arg0, %c0_i32_0 : i32, i32, i32
  }
  func.func @transform_4(%arg0: i32) -> (i32, i32) {
    %c0_i32 = arith.constant 0 : i32
    %c0_i32_0 = arith.constant 0 : i32
    return %arg0, %c0_i32 : i32, i32
  }
  func.func @transform_5(%arg0: i32) -> (i32, i32) {
    %c0_i32 = arith.constant 0 : i32
    %c0_i32_0 = arith.constant 0 : i32
    return %arg0, %c0_i32 : i32, i32
  }
}

</mosaic_0001>

<bundles_post_ra>
// kernel: tpu_custom_call.1
= control target key start
LH: loop header
LB: loop body
LE: loop exit
PB: predicated region body
PF: predicated region fallthrough
CT: control target
= control target key end

     0   :  { %11 = vsyncpa [#allocation3], 0  ;;  %s305_s0 = inlined_call_operand.hbm [shape: f32[2,4,256], index: 0, kind: input, shape index: {}]   ;;  %s306_s1 = inlined_call_operand.vmem [shape: f32[4,1], index: 1, kind: input, shape index: {}]   ;;  %s307_s2 = inlined_call_operand.vmem [shape: f32[4,1], index: 2, kind: input, shape index: {}]   ;;  %s308_s3 = inlined_call_operand.hbm [shape: f32[2,4,256], index: 3, kind: output, shape index: {0}]   ;;  %s309_s4 = inlined_call_operand.vmem [shape: f32[4,1], index: 4, kind: output, shape index: {1}]   ;;  %s310_s5 = inlined_call_operand.vmem [shape: f32[4,1], index: 5, kind: output, shape index: {2}]  }
   0x1   :  { %12 = vsyncpa [#allocation4], 0  ;;  %s17_s20 = sshll.u32 %s305_s0, 4  ;;  %s231_s21 = smov [#allocation2]   ;;  %s18_s20 = int_to_ptr.hbm [resolvable:$true] %s17_s20 }
   0x2   :  { %s19_s22 = sshll.u32 %s231_s21, 4  ;;  %s232_s23 = smov 128   ;;  %s20_s22 = int_to_ptr.vmem [resolvable:$true] %s19_s22 }
   0x3   :  { %s233_s24 = smov 8  }
   0x4   :  { %25 = dma.hbm_to_vmem [thread:$0]  %s18_s20, 256, %s20_s22, [#allocation3], %s232_s23, %s232_s23, %s233_s24  }
   0x5   :  { %227 = dma.done.wait [#allocation3], 256  }
   0x6   :  { %228 = vsyncadd [#allocation3], 4294967040  ;;  %v34_v0 = vld [vmem:[#allocation2] sm:$0xff]  ;;  %v35_v1 = vld [vmem:[#allocation2 + $0x8] sm:$0xff]  ;;  %vm49_vm0 = vcmask 1043456   ;;  %vm139_vm1 = vcmask 3072  }
   0x7   :  { %38 = vst [vmem:[#allocation1] ss:$2 sm:$0xff] %v34_v0  ;;  %v234_v13 = vmov 839922192   ;;  %v235_v36 = vmov 0  }
   0x8   :  { %42 = vst [vmem:[#allocation1 + $0x10] ss:$2 sm:$0xff] %v35_v1  ;;  %v66_v14 = vunpack.c.l.s4 %v234_v13  ;;  %175 = vset.pattern.permute.xlu2 %v235_v36  ;;  %176 = vset.pattern.permute.xlu0 %v235_v36  ;;  %v112_v50 = vld [vmem:[%s306_s1] sm:$0xf]  ;;  %s148_s1 = sshll.u32 %s308_s3, 4  ;;  %s149_s1 = int_to_ptr.hbm [resolvable:$true] %s148_s1 }
   0x9   :  { %v125_v53 = vld [vmem:[%s307_s2] sm:$0xf] }
   0xa   :  { %v67_v18 = vunpack.c.0.s8 %v66_v14 }
   0xe   :  { %v39_v2 = vld.sshfl [vmem:[#allocation1] sm:$0xff pattern:$0x75316420]  ;;  %v40_v3 = vld.sshfl [vmem:[#allocation1 + $0x8] sm:$0xff pattern:$0x75316420] }
   0xf   :  { %v50_v4 = vsel %vm49_vm0, %v39_v2, 0.0  ;;  %v51_v5 = vsel %vm49_vm0, %v40_v3, 0.0  ;;  %v43_v7 = vld.sshfl [vmem:[#allocation1 + $0x10] sm:$0xff pattern:$0x75316420] }
  0x10   :  { %v52_v6 = vadd.f32 %v51_v5, %v50_v4  ;;  %v44_v8 = vld.sshfl [vmem:[#allocation1 + $0x18] sm:$0xff pattern:$0x75316420]  ;;  %v55_v9 = vsel %vm49_vm0, %v43_v7, 0.0 }
  0x11   :  { %v56_v10 = vsel %vm49_vm0, %v44_v8, 0.0 }
  0x12   :  { %53 = vadd.xlane.f32.xlu0 %v52_v6  ;;  %v57_v11 = vadd.f32 %v56_v10, %v55_v9 }
  0x1a   :  { %58 = vadd.xlane.f32.xlu0 %v57_v11 }
  0x85   :  { %v54_v12 = vpop.xlane.xlu0 %53 }
  0x86   :  { %v60_v16 = vsel %vm49_vm0, %v54_v12, 0.0 }
  0x8d   :  { %v59_v15 = vpop.xlane.xlu0 %58 }
  0x8e   :  { %v61_v17 = vsel %vm49_vm0, %v59_v15, 0.0 }
  0x8f   :  { %v62_v19 = vadd.f32 %v61_v17, %v60_v16 }
  0x91   :  { %v63_v20 = vmul.f32 0.001953125, %v62_v19 }
  0x93   :  { %v68_v21 = vperm.slane %v63_v20, %v67_v18  ;;  %140 = vst.msk [vmem:[%s309_s4] sm:$0xf] %vm139_vm1, %v63_v20 }
  0x95   :  { %v70_v22 = vsub.f32 %v34_v0, %v68_v21  ;;  %v71_v23 = vsub.f32 %v35_v1, %v68_v21 }
  0x97   :  { %v72_v24 = vmul.f32 %v70_v22, %v70_v22  ;;  %v73_v25 = vmul.f32 %v71_v23, %v71_v23 }
  0x99   :  { %76 = vst [vmem:[#allocation1] ss:$2 sm:$0xff] %v72_v24 }
  0x9a   :  { %80 = vst [vmem:[#allocation1 + $0x10] ss:$2 sm:$0xff] %v73_v25 }
  0xa0   :  { %v77_v26 = vld.sshfl [vmem:[#allocation1] sm:$0xff pattern:$0x75316420]  ;;  %v78_v27 = vld.sshfl [vmem:[#allocation1 + $0x8] sm:$0xff pattern:$0x75316420] }
  0xa1   :  { %v87_v28 = vsel %vm49_vm0, %v77_v26, 0.0  ;;  %v88_v29 = vsel %vm49_vm0, %v78_v27, 0.0  ;;  %v81_v31 = vld.sshfl [vmem:[#allocation1 + $0x10] sm:$0xff pattern:$0x75316420] }
  0xa2   :  { %v89_v30 = vadd.f32 %v88_v29, %v87_v28  ;;  %v82_v32 = vld.sshfl [vmem:[#allocation1 + $0x18] sm:$0xff pattern:$0x75316420]  ;;  %v92_v33 = vsel %vm49_vm0, %v81_v31, 0.0 }
  0xa3   :  { %v93_v34 = vsel %vm49_vm0, %v82_v32, 0.0 }
  0xa4   :  { %90 = vadd.xlane.f32.xlu1 %v89_v30  ;;  %v94_v35 = vadd.f32 %v93_v34, %v92_v33 }
  0xac   :  { %95 = vadd.xlane.f32.xlu1 %v94_v35 }
 0x117   :  { %v91_v37 = vpop.xlane.xlu1 %90 }
 0x118   :  { %v97_v39 = vsel %vm49_vm0, %v91_v37, 0.0 }
 0x11f   :  { %v96_v38 = vpop.xlane.xlu1 %95 }
 0x120   :  { %v98_v40 = vsel %vm49_vm0, %v96_v38, 0.0 }
 0x121   :  { %v99_v41 = vadd.f32 %v98_v40, %v97_v39 }
 0x123   :  { %v100_v42 = vmul.f32 0.001953125, %v99_v41 }
 0x125   :  { %v101_v43 = vadd.f32 1e-05, %v100_v42  ;;  %141 = vst.msk [vmem:[%s310_s5] sm:$0xf] %vm139_vm1, %v100_v42  ;;  %s236_s5 = smov [#allocation5]  }
 0x126   :  { %s146_s6 = sshll.u32 %s236_s5, 4  ;;  %s147_s6 = int_to_ptr.vmem [resolvable:$true] %s146_s6 }
 0x127   :  { %177 = vrsqrt.f32 %v101_v43  ;;  %vm108_vm3 = vweird.f32 %v101_v43 }
 0x12d   :  { %v178_v44 = vpop.eup %177 }
 0x12e   :  { %v103_v45 = vmul.f32 %v178_v44, %v101_v43  ;;  %vm109_vm2 = vweird.f32 %v178_v44 }
 0x12f   :  { %vm110_vm4 = vmor %vm108_vm3, %vm109_vm2 }
 0x130   :  { %v104_v46 = vmul.f32 %v178_v44, %v103_v45 }
 0x132   :  { %v105_v47 = vmul.f32 0.5, %v104_v46 }
 0x134   :  { %v106_v48 = vsub.f32 1.5, %v105_v47 }
 0x136   :  { %v107_v49 = vmul.f32 %v178_v44, %v106_v48 }
 0x138   :  { %v111_v51 = vsel %vm110_vm4, %v178_v44, %v107_v49 }
 0x139   :  { %v113_v52 = vmul.f32 %v112_v50, %v111_v51 }
 0x13b   :  { %116 = vperm.xlu2 %175, %v113_v52  }
 0x143   :  { %128 = vperm.xlu2 %175, %v125_v53  }
 0x195   :  { %v117_v54 = vpop.permute.xlu2 %116 }
 0x196   :  { %v121_v55 = vperm.slane %v117_v54, %v67_v18 }
 0x198   :  { %v123_v57 = vmul.f32 %v121_v55, %v70_v22  ;;  %v124_v58 = vmul.f32 %v121_v55, %v71_v23 }
 0x19d   :  { %v129_v56 = vpop.permute.xlu2 %128 }
 0x19e   :  { %v133_v59 = vperm.slane %v129_v56, %v67_v18 }
 0x1a0   :  { %v135_v60 = vadd.f32 %v133_v59, %v123_v57  ;;  %v136_v61 = vadd.f32 %v133_v59, %v124_v58 }
 0x1a2   :  { %137 = vst [vmem:[#allocation5] sm:$0xff] %v135_v60 }
 0x1a3   :  { %138 = vst [vmem:[#allocation5 + $0x8] sm:$0xff] %v136_v61 }
 0x1a4   :  { %154 = dma.vmem_to_hbm [thread:$0]  %s147_s6, 256, %s149_s1, [#allocation4], %s232_s23, %s232_s23, %s233_s24  }
 0x1a5   :  { %229 = dma.done.wait [#allocation4], 256  }
 0x1a6   :  { %230 = vsyncadd [#allocation4], 4294967040 }
 0x1a7   :  { %167 = vsyncpa [#allocation3], 1 }
 0x1a8   :  { %168 = vsyncpa [#allocation4], 1 }

</bundles_post_ra>
